<compile_context>
chip_gen: v6e
topology: v6e:2x2x1
jax: 0.10.0
libtpu: 0.0.40
codegen_flags: <defaults>
</compile_context>

<pallas_src>
import functools

import jax
import jax.numpy as jnp
from jax.experimental import pallas as pl
from jax.experimental.pallas import tpu as pltpu


def _pdist_kernel_single(x_ref, yt_ref, x2_ref, y2_ref, o_ref):
    """2-D grid (N//tm, M//tn); full feature dim per block (tk == d).

    x_ref : (tm, d)   X panel (j-invariant -> VMEM-resident across j)
    yt_ref: (d, tn)   pre-transposed Y panel (MXU-native RHS layout)
    x2_ref: (tm, 1)   precomputed row norms of X (f32)
    y2_ref: (1, tn)   precomputed row norms of Y, lane-oriented (f32)
    o_ref : (tm, tn)  f32 output block
    """
    xy = jax.lax.dot_general(
        x_ref[...], yt_ref[...],
        dimension_numbers=(((1,), (0,)), ((), ())),
        preferred_element_type=jnp.float32,
    )
    o_ref[...] = x2_ref[...] + y2_ref[...] - 2.0 * xy


def _pdist_kernel_ksplit(x_ref, yt_ref, x2_ref, y2_ref, o_ref):
    """Fallback 3-D grid (N//tm, M//tn, d//tk) for very large feature dims.

    Output block is the accumulator (out BlockSpec ignores k, axis marked
    "arbitrary").  Same MXU-native RHS layout as the single-pass kernel.
    """
    k = pl.program_id(2)

    @pl.when(k == 0)
    def _init():
        o_ref[...] = jnp.zeros_like(o_ref)

    o_ref[...] += jax.lax.dot_general(
        x_ref[...], yt_ref[...],
        dimension_numbers=(((1,), (0,)), ((), ())),
        preferred_element_type=jnp.float32,
    )

    @pl.when(k == pl.num_programs(2) - 1)
    def _finalize():
        o_ref[...] = x2_ref[...] + y2_ref[...] - 2.0 * o_ref[...]


@functools.partial(jax.jit, static_argnames=("tm", "tn", "tk", "max_single_pass_k"))
def pairwise_distance_matrix(X, Y, *, tm=512, tn=512, tk=512,
                             max_single_pass_k=2048):
    N, dX = X.shape
    M, dY = Y.shape
    assert dX == dY, "feature dims must match"
    d = dX

    itemsize = jnp.dtype(X.dtype).itemsize

    # Clamp tiles to the problem size.
    tm = min(tm, N)
    tn = min(tn, M)

    single_pass = d <= max_single_pass_k
    tk_eff = d if single_pass else min(tk, d)

    # Conservative double-buffered VMEM footprint (bytes); shrink tiles until it
    # fits a ~40 MiB budget (safe headroom even on v7x's 64 MiB physical VMEM).
    def _footprint(tm_, tn_):
        return 2 * ((tm_ * tk_eff + tk_eff * tn_) * itemsize   # X / Yt panels
                    + tm_ * tn_ * 4                            # f32 output block
                    + (tm_ + tn_) * 4)                         # norm slivers

    vmem_budget = 40 << 20
    while _footprint(tm, tn) > vmem_budget and (tm > 128 or tn > 128):
        if tm >= tn and tm > 128:
            tm //= 2
        elif tn > 128:
            tn //= 2
        else:
            break

    # Exact tiling required (pad upstream otherwise).
    assert N % tm == 0 and M % tn == 0 and d % tk_eff == 0, (
        "shapes must be divisible by tile sizes")

    # Precompute squared row norms once in f32 (single fused XLA reduce each).
    Xf = X.astype(jnp.float32)
    Yf = Y.astype(jnp.float32)
    X2 = jnp.sum(Xf * Xf, axis=1, keepdims=True)          # (N, 1)
    Y2 = jnp.sum(Yf * Yf, axis=1, keepdims=True).T        # (1, M)

    # One-time transpose of Y to MXU-native (K, N) layout; amortized over all
    # N/tm re-reads and removes the per-step XLU transpose inside the kernel.
    Yt = Y.T                                               # (d, M)

    vmem_limit = max(_footprint(tm, tn) + (8 << 20), 32 << 20)

    if single_pass:
        # X is read once (j-invariant), Yt re-streamed N/tm times.
        bytes_accessed = (N * d * itemsize
                          + (M * d * itemsize) * (N // tm)
                          + (N + M) * 4
                          + N * M * 4)
    else:
        bytes_accessed = ((N * d * itemsize) * (M // tn)
                          + (M * d * itemsize) * (N // tm)
                          + (N + M) * 4
                          + N * M * 4)
    cost = pl.CostEstimate(
        flops=2 * N * M * d,
        transcendentals=0,
        bytes_accessed=bytes_accessed,
    )

    if single_pass:
        grid = (N // tm, M // tn)
        in_specs = [
            pl.BlockSpec((tm, d), lambda i, j: (i, 0)),    # X panel (j-invariant)
            pl.BlockSpec((d, tn), lambda i, j: (0, j)),    # Yt panel
            pl.BlockSpec((tm, 1), lambda i, j: (i, 0)),    # X2 column
            pl.BlockSpec((1, tn), lambda i, j: (0, j)),    # Y2 row
        ]
        out_specs = pl.BlockSpec((tm, tn), lambda i, j: (i, j))
        kernel = _pdist_kernel_single
        dims = ("parallel", "parallel")
    else:
        grid = (N // tm, M // tn, d // tk_eff)
        in_specs = [
            pl.BlockSpec((tm, tk_eff), lambda i, j, k: (i, k)),  # X tile
            pl.BlockSpec((tk_eff, tn), lambda i, j, k: (k, j)),  # Yt tile
            pl.BlockSpec((tm, 1), lambda i, j, k: (i, 0)),       # X2 column
            pl.BlockSpec((1, tn), lambda i, j, k: (0, j)),       # Y2 row
        ]
        out_specs = pl.BlockSpec((tm, tn), lambda i, j, k: (i, j))
        kernel = _pdist_kernel_ksplit
        dims = ("parallel", "parallel", "arbitrary")

    return pl.pallas_call(
        kernel,
        out_shape=jax.ShapeDtypeStruct((N, M), jnp.float32),
        grid_spec=pltpu.PrefetchScalarGridSpec(
            num_scalar_prefetch=0,
            grid=grid,
            in_specs=in_specs,
            out_specs=out_specs,
        ),
        compiler_params=pltpu.CompilerParams(
            dimension_semantics=dims,
            vmem_limit_bytes=vmem_limit,
        ),
        cost_estimate=cost,
    )(X, Yt, X2, Y2)


def pairwise_distance_matrix_ref(X, Y):
    X2 = jnp.sum(X ** 2, axis=1).reshape(-1, 1)
    Y2 = jnp.sum(Y ** 2, axis=1).reshape(1, -1)
    return X2 + Y2 - 2.0 * (X @ Y.T)


if __name__ == "__main__":
    key = jax.random.PRNGKey(0)
    kx, ky = jax.random.split(key)

    # Small shapes; explicit tiles so the grid has multiple (parallel) points.
    N, M, d = 256, 512, 128
    X = jax.random.normal(kx, (N, d), dtype=jnp.float32)
    Y = jax.random.normal(ky, (M, d), dtype=jnp.float32)

    D = pairwise_distance_matrix(X, Y, tm=128, tn=256)   # grid (2, 2), tk = d
    jax.block_until_ready(D)

    D_ref = pairwise_distance_matrix_ref(X, Y)
    assert D.shape == (N, M)
    assert jnp.allclose(D, D_ref, atol=1e-3, rtol=1e-3), "mismatch vs reference"

    print("KERNEL_OK")
</pallas_src>

<mosaic_0001>
module attributes {stable_mosaic.version = 11 : i64} {
  func.func @_pdist_kernel_single(%arg0: i32, %arg1: i32, %arg2: memref<128x128xf32, #tpu.memory_space<vmem>>, %arg3: memref<128x256xf32, #tpu.memory_space<vmem>>, %arg4: memref<128x1xf32, #tpu.memory_space<vmem>>, %arg5: memref<1x256xf32, #tpu.memory_space<vmem>>, %arg6: memref<128x256xf32, #tpu.memory_space<vmem>>) attributes {dimension_semantics = [#tpu.dimension_semantics<parallel>, #tpu.dimension_semantics<parallel>], iteration_bounds = array<i64: 2, 2>, scalar_prefetch = 0 : i64, scratch_operands = 0 : i64, tpu.core_type = #tpu.core_type<tc>, window_params = [{transform_indices = @transform_0, window_bounds = array<i64: 128, 128>}, {transform_indices = @transform_1, window_bounds = array<i64: 128, 256>}, {transform_indices = @transform_2, window_bounds = array<i64: 128, 1>}, {transform_indices = @transform_3, window_bounds = array<i64: 1, 256>}, {transform_indices = @transform_4, window_bounds = array<i64: 128, 256>}]} {
    %c0 = arith.constant 0 : index
    %c0_0 = arith.constant 0 : index
    %0 = vector.load %arg2[%c0, %c0_0] : memref<128x128xf32, #tpu.memory_space<vmem>>, vector<128x128xf32>
    %c0_1 = arith.constant 0 : index
    %c0_2 = arith.constant 0 : index
    %1 = vector.load %arg3[%c0_1, %c0_2] : memref<128x256xf32, #tpu.memory_space<vmem>>, vector<128x256xf32>
    %cst = arith.constant dense<0.000000e+00> : vector<128x256xf32>
    %2 = tpu.matmul %0, %1, %cst {dimension_numbers = #tpu.dot_dimension_numbers<[1], [0], [0], [1], [0, 0, 1, 1], [], []>} : vector<128x128xf32>, vector<128x256xf32>, vector<128x256xf32> -> vector<128x256xf32>
    %c0_3 = arith.constant 0 : index
    %c0_4 = arith.constant 0 : index
    %3 = vector.load %arg4[%c0_3, %c0_4] : memref<128x1xf32, #tpu.memory_space<vmem>>, vector<128x1xf32>
    %c0_5 = arith.constant 0 : index
    %c0_6 = arith.constant 0 : index
    %4 = vector.load %arg5[%c0_5, %c0_6] : memref<1x256xf32, #tpu.memory_space<vmem>>, vector<1x256xf32>
    %5 = vector.broadcast %3 : vector<128x1xf32> to vector<128x256xf32>
    %6 = vector.broadcast %4 : vector<1x256xf32> to vector<128x256xf32>
    %7 = arith.addf %5, %6 : vector<128x256xf32>
    %cst_7 = arith.constant 2.000000e+00 : f32
    %8 = vector.broadcast %cst_7 : f32 to vector<128x256xf32>
    %9 = arith.mulf %8, %2 : vector<128x256xf32>
    %10 = arith.subf %7, %9 : vector<128x256xf32>
    %c0_8 = arith.constant 0 : index
    %c0_9 = arith.constant 0 : index
    %11 = vector.load %arg6[%c0_8, %c0_9] : memref<128x256xf32, #tpu.memory_space<vmem>>, vector<128x256xf32>
    tpu.vector_store %arg6[%c0_8, %c0_9], %10 {strides = array<i32>} : memref<128x256xf32, #tpu.memory_space<vmem>>, vector<128x256xf32>,
    return
  }
  func.func @transform_0(%arg0: i32, %arg1: i32) -> (i32, i32) {
    %c0_i32 = arith.constant 0 : i32
    %c0_i32_0 = arith.constant 0 : i32
    return %arg0, %c0_i32 : i32, i32
  }
  func.func @transform_1(%arg0: i32, %arg1: i32) -> (i32, i32) {
    %c0_i32 = arith.constant 0 : i32
    %c0_i32_0 = arith.constant 0 : i32
    return %c0_i32, %arg1 : i32, i32
  }
  func.func @transform_2(%arg0: i32, %arg1: i32) -> (i32, i32) {
    %c0_i32 = arith.constant 0 : i32
    %c0_i32_0 = arith.constant 0 : i32
    return %arg0, %c0_i32 : i32, i32
  }
  func.func @transform_3(%arg0: i32, %arg1: i32) -> (i32, i32) {
    %c0_i32 = arith.constant 0 : i32
    %c0_i32_0 = arith.constant 0 : i32
    return %c0_i32, %arg1 : i32, i32
  }
  func.func @transform_4(%arg0: i32, %arg1: i32) -> (i32, i32) {
    %c0_i32 = arith.constant 0 : i32
    return %arg0, %arg1 : i32, i32
  }
}

</mosaic_0001>

<bundles_post_ra>
// kernel: pairwise_distance_matrix.1
= control target key start
LH: loop header
LB: loop body
LE: loop exit
PB: predicated region body
PF: predicated region fallthrough
CT: control target
= control target key end

     0   :  { %9 = vsyncpa [#allocation4], 0  ;;  %s1668_s0 = inlined_call_operand.vmem [shape: f32[256,128], index: 0, kind: input, shape index: {}]   ;;  %s1669_s1 = inlined_call_operand.vmem [shape: f32[128,512], index: 1, kind: input, shape index: {}]   ;;  %s1670_s2 = inlined_call_operand.vmem [shape: f32[256,1], index: 2, kind: input, shape index: {}]   ;;  %s1671_s3 = inlined_call_operand.vmem [shape: f32[1,512], index: 3, kind: input, shape index: {}]   ;;  %s1672_s4 = inlined_call_operand.hbm [shape: f32[256,512], index: 4, kind: output, shape index: {}]  }
   0x1   :  { %11 = vsyncpa [#allocation4 + $0x1], 0  ;;  %s1226_s15 = smov 0   ;;  %s1228_s16 = smov 0  }
   0x2   :  { %s1230_s17 = smov 0   ;;  %s1232_s18 = smov 0  }
   0x3   :  { %s1234_s19 = smov 0   ;;  %s1236_s20 = smov 0  }
   0x4   :  { %s1238_s21 = smov 0   ;;  %s1240_s22 = smov 0  }
   0x5   :  { %s1242_s23 = smov 0   ;;  %s1244_s24 = smov 0  }
   0x6 LB: > { %s935_s25 = sadd.s32 4294967295, %s1193_s24   ;;  %s936_s26 = sadd.s32 4294967294, %s1193_s24   ;;  %s1193_s24 = sphi %s1244_s24, %s17_s24   ;;  %s1189_s23 = sphi %s1242_s23, %s1684_s23   ;;  %s1185_s22 = sphi %s1240_s22, %s1683_s22   ;;  %s1181_s21 = sphi %s1238_s21, %s1682_s21   ;;  %s1177_s20 = sphi %s1236_s20, %s1681_s20   ;;  %s1173_s19 = sphi %s1234_s19, %s1680_s19   ;;  %s1169_s18 = sphi %s1232_s18, %s1679_s18   ;;  %s1165_s17 = sphi %s1230_s17, %s1678_s17   ;;  %s1161_s16 = sphi %s1228_s16, %s1677_s16   ;;  %s1157_s15 = sphi %s1226_s15, %s1676_s15  }
   0x7   : > { %s26_s27 = sadd.s32 1, %s1185_s22  ;;  %s29_s28 = sadd.s32 1, %s1189_s23 }
   0x8   : > { %p27_p0 = scmp.ge.s32.totalorder %s26_s27, 2  ;;  %s62_s29 = sadd.s32 1, %s1173_s19 }
   0x9   : > { %p69_p1 = scmp.ne.s32.totalorder %s1173_s19, %s1169_s18  ;;  %p70_p2 = scmp.eq.s32.totalorder %s1193_s24, 0 }
   0xa   : > { %s1686_s27 = smov (%p27_p0, %s26_s27), 0  ;;  %s1688_s28 = smov (!%p27_p0, %s29_s28), %s1189_s23 }
   0xb   : > { %s59_s30 = ssub.s32 %s1185_s22, %s1686_s27  ;;  %p1289_p3 = por %p70_p2, %p69_p1 }
   0xc   : > { %p31_p4 = scmp.ge.s32.totalorder %s1688_s28, 2  ;;  %p60_p5 = scmp.eq.s32.totalorder %s59_s30, 0 }
   0xd   : > { %s142_s6 = sadd.s32 1, %s1165_s17  ;;  %p152_p6 = scmp.ne.s32.totalorder %s1165_s17, %s1161_s16 }
   0xe   : > { %s1690_s28 = smov (%p31_p4, %s1688_s28), 0  ;;  %p153_p7 = scmp.eq.s32.totalorder %s935_s25, 3 }
   0xf   : > { %s1299_s7 = scalar_select %p60_p5, %s1173_s19, %s62_s29  }
  0x10   : > { %s137_s8 = ssub.s32 %s1189_s23, %s1690_s28  ;;  %p158_p8 = scmp.ne.s32.totalorder %s1161_s16, %s1157_s15 }
  0x11   : > { %s139_s9 = sor.u32 %s137_s8, %s59_s30  ;;  %p1305_p10 = por %p153_p7, %p152_p6 }
  0x12   : > { %p140_p9 = scmp.eq.s32.totalorder %s139_s9, 0  ;;  %p159_p11 = scmp.eq.s32.totalorder %s936_s26, 3 }
  0x13   : > { %p938_p13 = scmp.ge.s32.totalorder %s1193_s24, 4 }
  0x14   : > { %s1310_s11 = scalar_select %p140_p9, %s1165_s17, %s142_s6  }
  0x15   : > { %p1312_p12 = por %p159_p11, %p158_p8  ;;  %175 = sbr.rel (%p938_p13) target bundleno = 46 (0x2e), region = 16 }
  0x1a   : > { %187 = sbr.rel (!%p1289_p3) target bundleno = 46 (0x2e), region = 24  ;;  %s189_s13 = sand.u32 (%p1289_p3), 1, %s1173_s19  }
  0x1b   : > { %s957_s14 = sshll.u32 (%p1289_p3), %s1185_s22, 4  ;;  %s939_s25 = sshll.u32 (%p1289_p3), %s189_s13, 8 }
  0x1c   : > { %s1324_s26 = scalar_lea.vmem (%p1289_p3), %s1669_s1, %s957_s14  ;;  %s1329_s5 = scalar_lea.vmem (%p1289_p3), [#allocation2], %s939_s25 }
  0x1d   : > { %v207_v0 = vld [vmem:[%s1324_s26] sm:$0xff] (%p1289_p3)  ;;  %v209_v1 = vld [vmem:[%s1324_s26 + $0x8] sm:$0xff] (%p1289_p3) }
  0x1e   : > { %v211_v2 = vld [vmem:[%s1324_s26 + $0x20] sm:$0xff] (%p1289_p3)  ;;  %208 = vst [vmem:[%s1329_s5] sm:$0xff] (%p1289_p3), %v207_v0  ;;  %210 = vst [vmem:[%s1329_s5 + $0x8] sm:$0xff] (%p1289_p3), %v209_v1  ;;  %v213_v3 = vld [vmem:[%s1324_s26 + $0x28] sm:$0xff] (%p1289_p3) }
  0x1f   : > { %212 = vst [vmem:[%s1329_s5 + $0x10] sm:$0xff] %v211_v2  ;;  %v215_v4 = vld [vmem:[%s1324_s26 + $0x40] sm:$0xff]  ;;  %v217_v5 = vld [vmem:[%s1324_s26 + $0x48] sm:$0xff]  ;;  %214 = vst [vmem:[%s1329_s5 + $0x18] sm:$0xff] %v213_v3 }
  0x20   : > { %216 = vst [vmem:[%s1329_s5 + $0x20] sm:$0xff] %v215_v4  ;;  %218 = vst [vmem:[%s1329_s5 + $0x28] sm:$0xff] %v217_v5  ;;  %v219_v6 = vld [vmem:[%s1324_s26 + $0x60] sm:$0xff]  ;;  %v221_v7 = vld [vmem:[%s1324_s26 + $0x68] sm:$0xff] }
  0x21   : > { %v223_v8 = vld [vmem:[%s1324_s26 + $0x80] sm:$0xff]  ;;  %220 = vst [vmem:[%s1329_s5 + $0x30] sm:$0xff] %v219_v6  ;;  %222 = vst [vmem:[%s1329_s5 + $0x38] sm:$0xff] %v221_v7  ;;  %v225_v9 = vld [vmem:[%s1324_s26 + $0x88] sm:$0xff] }
  0x22   : > { %224 = vst [vmem:[%s1329_s5 + $0x40] sm:$0xff] %v223_v8  ;;  %v227_v10 = vld [vmem:[%s1324_s26 + $0xa0] sm:$0xff]  ;;  %v229_v11 = vld [vmem:[%s1324_s26 + $0xa8] sm:$0xff]  ;;  %226 = vst [vmem:[%s1329_s5 + $0x48] sm:$0xff] %v225_v9 }
  0x23   : > { %228 = vst [vmem:[%s1329_s5 + $0x50] sm:$0xff] %v227_v10  ;;  %230 = vst [vmem:[%s1329_s5 + $0x58] sm:$0xff] %v229_v11  ;;  %v231_v12 = vld [vmem:[%s1324_s26 + $0xc0] sm:$0xff]  ;;  %v233_v13 = vld [vmem:[%s1324_s26 + $0xc8] sm:$0xff] }
  0x24   : > { %v235_v14 = vld [vmem:[%s1324_s26 + $0xe0] sm:$0xff]  ;;  %232 = vst [vmem:[%s1329_s5 + $0x60] sm:$0xff] %v231_v12  ;;  %234 = vst [vmem:[%s1329_s5 + $0x68] sm:$0xff] %v233_v13  ;;  %v237_v15 = vld [vmem:[%s1324_s26 + $0xe8] sm:$0xff] }
  0x25   : > { %236 = vst [vmem:[%s1329_s5 + $0x70] sm:$0xff] %v235_v14  ;;  %v239_v16 = vld [vmem:[%s1324_s26 + $0x100] sm:$0xff]  ;;  %v241_v17 = vld [vmem:[%s1324_s26 + $0x108] sm:$0xff]  ;;  %238 = vst [vmem:[%s1329_s5 + $0x78] sm:$0xff] %v237_v15 }
  0x26   : > { %240 = vst [vmem:[%s1329_s5 + $0x80] sm:$0xff] %v239_v16  ;;  %242 = vst [vmem:[%s1329_s5 + $0x88] sm:$0xff] %v241_v17  ;;  %v243_v18 = vld [vmem:[%s1324_s26 + $0x120] sm:$0xff]  ;;  %v245_v19 = vld [vmem:[%s1324_s26 + $0x128] sm:$0xff] }
  0x27   : > { %v247_v20 = vld [vmem:[%s1324_s26 + $0x140] sm:$0xff]  ;;  %244 = vst [vmem:[%s1329_s5 + $0x90] sm:$0xff] %v243_v18  ;;  %246 = vst [vmem:[%s1329_s5 + $0x98] sm:$0xff] %v245_v19  ;;  %v249_v21 = vld [vmem:[%s1324_s26 + $0x148] sm:$0xff] }
  0x28   : > { %248 = vst [vmem:[%s1329_s5 + $0xa0] sm:$0xff] %v247_v20  ;;  %v251_v22 = vld [vmem:[%s1324_s26 + $0x160] sm:$0xff]  ;;  %v253_v23 = vld [vmem:[%s1324_s26 + $0x168] sm:$0xff]  ;;  %250 = vst [vmem:[%s1329_s5 + $0xa8] sm:$0xff] %v249_v21 }
  0x29   : > { %252 = vst [vmem:[%s1329_s5 + $0xb0] sm:$0xff] %v251_v22  ;;  %254 = vst [vmem:[%s1329_s5 + $0xb8] sm:$0xff] %v253_v23  ;;  %v255_v24 = vld [vmem:[%s1324_s26 + $0x180] sm:$0xff]  ;;  %v257_v25 = vld [vmem:[%s1324_s26 + $0x188] sm:$0xff] }
  0x2a   : > { %v259_v26 = vld [vmem:[%s1324_s26 + $0x1a0] sm:$0xff]  ;;  %256 = vst [vmem:[%s1329_s5 + $0xc0] sm:$0xff] %v255_v24  ;;  %258 = vst [vmem:[%s1329_s5 + $0xc8] sm:$0xff] %v257_v25  ;;  %v261_v27 = vld [vmem:[%s1324_s26 + $0x1a8] sm:$0xff] }
  0x2b   : > { %260 = vst [vmem:[%s1329_s5 + $0xd0] sm:$0xff] %v259_v26  ;;  %v263_v28 = vld [vmem:[%s1324_s26 + $0x1c0] sm:$0xff]  ;;  %v265_v29 = vld [vmem:[%s1324_s26 + $0x1c8] sm:$0xff]  ;;  %262 = vst [vmem:[%s1329_s5 + $0xd8] sm:$0xff] %v261_v27 }
  0x2c   : > { %264 = vst [vmem:[%s1329_s5 + $0xe0] sm:$0xff] %v263_v28  ;;  %266 = vst [vmem:[%s1329_s5 + $0xe8] sm:$0xff] %v265_v29  ;;  %v267_v30 = vld [vmem:[%s1324_s26 + $0x1e0] sm:$0xff]  ;;  %v269_v31 = vld [vmem:[%s1324_s26 + $0x1e8] sm:$0xff] }
  0x2d   : > { %268 = vst [vmem:[%s1329_s5 + $0xf0] sm:$0xff] %v267_v30  ;;  %270 = vst [vmem:[%s1329_s5 + $0xf8] sm:$0xff] %v269_v31 }
  0x2e PF: > { %p942_p0 = scmp.ge.s32.totalorder %s1193_s24, 1  ;;  %p292_p1 = scmp.lt.s32.totalorder %s1193_s24, 5 }
  0x30   : > { %p293_p2 = pnand %p942_p0, %p292_p1 }
  0x31   : > { %s299_s6 = sand.u32 (!%p293_p2), 1, %s1169_s18   ;;  %s945_s18 = sshll.u32 (!%p293_p2), %s1181_s21, 4 }
  0x32   : > { %296 = sbr.rel (%p293_p2) target bundleno = 332 (0x14c), region = 55  ;;  %s943_s8 = sshll.u32 (!%p293_p2), %s299_s6, 8 }
  0x33   : > { %s1397_s9 = scalar_lea.vmem (!%p293_p2), [#allocation2], %s943_s8  ;;  %p339_p3 = scmp.lt.s32.totalorder (!%p293_p2), %s945_s18, 31 }
  0x34   : > { %s1492_s6 = sshll.u32 (!%p293_p2), %s1177_s20, 1 }
  0x35   : > { %p352_p4 = scmp.lt.s32.totalorder (!%p293_p2), %s1492_s6, 3 }
  0x37   : > { %v1195_v32 = vmov 0.0   ;;  %v1196_v33 = vmov 0   ;;  %v405_v34 = vld [vmem:[%s1397_s9 + $0xf8] sm:$0xff]  ;;  %v404_v35 = vld [vmem:[%s1397_s9 + $0xf0] sm:$0xff]  ;;  %v403_v36 = vld [vmem:[%s1397_s9 + $0xe8] sm:$0xff]  ;;  %s1692_s18 = smov (!%p339_p3, %s945_s18), 31 }
  0x38   : > { %470 = vmatprep.mubr.f32.mxu0 %v1195_v32  ;;  %518 = vmatprep.mubr.f32.mxu1 %v1195_v32  ;;  %v402_v37 = vld [vmem:[%s1397_s9 + $0xe0] sm:$0xff]  ;;  %v401_v38 = vld [vmem:[%s1397_s9 + $0xd8] sm:$0xff]  ;;  %v400_v39 = vld [vmem:[%s1397_s9 + $0xd0] sm:$0xff]  ;;  %s946_s13 = sshll.u32 %s1692_s18, 3 }
  0x39   : > { %1084 = vset.pattern.permute.xlu1 %v1196_v33  ;;  %1083 = vset.pattern.permute.xlu0 %v1196_v33  ;;  %v399_v40 = vld [vmem:[%s1397_s9 + $0xc8] sm:$0xff]  ;;  %v398_v41 = vld [vmem:[%s1397_s9 + $0xc0] sm:$0xff]  ;;  %v397_v42 = vld [vmem:[%s1397_s9 + $0xb8] sm:$0xff]  ;;  %s1436_s29 = scalar_lea.vmem %s1668_s0, %s946_s13  ;;  %s1443_s5 = scalar_lea.vmem %s1670_s2, %s946_s13 }
  0x3a   : > { %406 = vmatprep.subr.mxu0 %v405_v34  ;;  %959 = vmatprep.subr.mxu1 %v405_v34  ;;  %v396_v43 = vld [vmem:[%s1397_s9 + $0xb0] sm:$0xff]  ;;  %v395_v44 = vld [vmem:[%s1397_s9 + $0xa8] sm:$0xff]  ;;  %v394_v45 = vld [vmem:[%s1397_s9 + $0xa0] sm:$0xff]  ;;  %s353_s8 = scalar_select %p352_p4, %s1492_s6, 3 }
  0x3b   : > { %407 = vmatpush1.msra.mxu0 %v404_v35  ;;  %975 = vmatpush1.msra.mxu1 %v404_v35  ;;  %v393_v46 = vld [vmem:[%s1397_s9 + $0x98] sm:$0xff]  ;;  %v392_v47 = vld [vmem:[%s1397_s9 + $0x90] sm:$0xff]  ;;  %v391_v48 = vld [vmem:[%s1397_s9 + $0x88] sm:$0xff]  ;;  %s335_s13 = sand.u32 1, %s1161_s16  }
  0x3c   : > { %408 = vmatprep.subr.mxu0 %v403_v36  ;;  %960 = vmatprep.subr.mxu1 %v403_v36  ;;  %v390_v49 = vld [vmem:[%s1397_s9 + $0x80] sm:$0xff]  ;;  %v389_v50 = vld [vmem:[%s1397_s9 + $0x78] sm:$0xff]  ;;  %v388_v51 = vld [vmem:[%s1397_s9 + $0x70] sm:$0xff]  ;;  %s354_s20 = scalar_lea.vmem %s1671_s3, %s353_s8  ;;  %s944_s14 = sshll.u32 %s335_s13, 8 }
  0x3d   : > { %409 = vmatpush1.msra.mxu0 %v402_v37  ;;  %976 = vmatpush1.msra.mxu1 %v402_v37  ;;  %v387_v52 = vld [vmem:[%s1397_s9 + $0x68] sm:$0xff]  ;;  %v386_v53 = vld [vmem:[%s1397_s9 + $0x60] sm:$0xff]  ;;  %v385_v54 = vld [vmem:[%s1397_s9 + $0x58] sm:$0xff]  ;;  %s1524_s25 = scalar_lea.vmem [#allocation3], %s944_s14 }
  0x3e   : > { %410 = vmatprep.subr.mxu0 %v401_v38  ;;  %961 = vmatprep.subr.mxu1 %v401_v38  ;;  %v384_v55 = vld [vmem:[%s1397_s9 + $0x50] sm:$0xff]  ;;  %v383_v56 = vld [vmem:[%s1397_s9 + $0x48] sm:$0xff]  ;;  %v382_v57 = vld [vmem:[%s1397_s9 + $0x40] sm:$0xff]  ;;  %s820_s26 = sshll.u32 %s1524_s25, 4  ;;  %s1603_s26 = int_to_ptr.vmem [resolvable:$true] %s820_s26 }
  0x3f   : > { %411 = vmatpush1.msra.mxu0 %v400_v39  ;;  %977 = vmatpush1.msra.mxu1 %v400_v39  ;;  %v381_v58 = vld [vmem:[%s1397_s9 + $0x38] sm:$0xff]  ;;  %v380_v59 = vld [vmem:[%s1397_s9 + $0x30] sm:$0xff]  ;;  %v379_v60 = vld [vmem:[%s1397_s9 + $0x28] sm:$0xff]  ;;  %s1085_s18 = scalar_lea.vmem %s1603_s26, 4096 }
  0x40   : > { %412 = vmatprep.subr.mxu0 %v399_v40  ;;  %962 = vmatprep.subr.mxu1 %v399_v40  ;;  %v378_v61 = vld [vmem:[%s1397_s9 + $0x20] sm:$0xff]  ;;  %v377_v62 = vld [vmem:[%s1397_s9 + $0x18] sm:$0xff]  ;;  %v376_v63 = vld [vmem:[%s1397_s9 + $0x10] sm:$0xff]  ;;  %p1086_p5 = scmp.ne.s32.totalorder %s1603_s26, %s1085_s18 }
  0x41   : > { %413 = vmatpush1.msra.mxu0 %v398_v41  ;;  %978 = vmatpush1.msra.mxu1 %v398_v41  ;;  %v375_v0 = vld [vmem:[%s1397_s9 + $0x8] sm:$0xff]  ;;  %v374_v1 = vld [vmem:[%s1397_s9] sm:$0xff]  ;;  %v569_v4 = vld [vmem:[%s1443_s5 + $0x10] sm:$0xff]  ;;  %s1611_s9 = scalar_lea.sflag [#allocation4], %s335_s13 }
  0x42   : > { %414 = vmatprep.subr.mxu0 %v397_v42  ;;  %963 = vmatprep.subr.mxu1 %v397_v42  ;;  %v358_v2 = vld [vmem:[%s1436_s29] sm:$0xff]  ;;  %v359_v6 = vld [vmem:[%s1436_s29 + $0x8] sm:$0xff]  ;;  %v570_v8 = vld [vmem:[%s1443_s5 + $0x18] sm:$0xff]  ;;  %p1087_p6 = pnand %p1086_p5, %p1305_p10 }
  0x43   : > { %415 = vmatpush1.msra.mxu0 %v396_v43  ;;  %979 = vmatpush1.msra.mxu1 %v396_v43  ;;  %v366_v3 = vld [vmem:[%s1436_s29 + $0x40] sm:$0xff]  ;;  %v367_v7 = vld [vmem:[%s1436_s29 + $0x48] sm:$0xff]  ;;  %v360_v10 = vld [vmem:[%s1436_s29 + $0x10] sm:$0xff] }
  0x44   : > { %416 = vmatprep.subr.mxu0 %v395_v44  ;;  %964 = vmatprep.subr.mxu1 %v395_v44  ;;  %v567_v5 = vld [vmem:[%s1443_s5] sm:$0xff]  ;;  %v568_v9 = vld [vmem:[%s1443_s5 + $0x8] sm:$0xff]  ;;  %v368_v11 = vld [vmem:[%s1436_s29 + $0x50] sm:$0xff]  ;;  %p1088_p7 = pneg %p1087_p6 }
  0x45   : > { %417 = vmatpush1.msra.mxu0 %v394_v45  ;;  %980 = vmatpush1.msra.mxu1 %v394_v45  ;;  %v572_v12 = vld [vmem:[%s1443_s5 + $0x28] sm:$0xff]  ;;  %v571_v13 = vld [vmem:[%s1443_s5 + $0x20] sm:$0xff]  ;;  %v361_v14 = vld [vmem:[%s1436_s29 + $0x18] sm:$0xff] }
  0x46   : > { %418 = vmatprep.subr.mxu0 %v393_v46  ;;  %965 = vmatprep.subr.mxu1 %v393_v46  ;;  %v369_v15 = vld [vmem:[%s1436_s29 + $0x58] sm:$0xff]  ;;  %v573_v17 = vld [vmem:[%s1443_s5 + $0x30] sm:$0xff]  ;;  %v362_v18 = vld [vmem:[%s1436_s29 + $0x20] sm:$0xff] }
  0x47   : > { %419 = vmatpush1.msra.mxu0 %v392_v47  ;;  %981 = vmatpush1.msra.mxu1 %v392_v47  ;;  %v574_v16 = vld [vmem:[%s1443_s5 + $0x38] sm:$0xff]  ;;  %v370_v19 = vld [vmem:[%s1436_s29 + $0x60] sm:$0xff]  ;;  %v576_v20 = vld [vmem:[%s1443_s5 + $0x48] sm:$0xff] }
  0x48   : > { %420 = vmatprep.subr.mxu0 %v391_v48  ;;  %966 = vmatprep.subr.mxu1 %v391_v48  ;;  %v575_v21 = vld [vmem:[%s1443_s5 + $0x40] sm:$0xff]  ;;  %v363_v22 = vld [vmem:[%s1436_s29 + $0x28] sm:$0xff]  ;;  %v578_v24 = vld [vmem:[%s1443_s5 + $0x58] sm:$0xff] }
  0x49   : > { %421 = vmatpush1.msra.mxu0 %v390_v49  ;;  %982 = vmatpush1.msra.mxu1 %v390_v49  ;;  %v371_v23 = vld [vmem:[%s1436_s29 + $0x68] sm:$0xff]  ;;  %v577_v25 = vld [vmem:[%s1443_s5 + $0x50] sm:$0xff]  ;;  %v579_v29 = vld [vmem:[%s1443_s5 + $0x60] sm:$0xff] }
  0x4a   : > { %422 = vmatprep.subr.mxu0 %v389_v50  ;;  %967 = vmatprep.subr.mxu1 %v389_v50  ;;  %v364_v26 = vld [vmem:[%s1436_s29 + $0x30] sm:$0xff]  ;;  %v580_v28 = vld [vmem:[%s1443_s5 + $0x68] sm:$0xff]  ;;  %v365_v30 = vld [vmem:[%s1436_s29 + $0x38] sm:$0xff] }
  0x4b   : > { %423 = vmatpush1.msra.mxu0 %v388_v51  ;;  %983 = vmatpush1.msra.mxu1 %v388_v51  ;;  %v372_v27 = vld [vmem:[%s1436_s29 + $0x70] sm:$0xff]  ;;  %v373_v31 = vld [vmem:[%s1436_s29 + $0x78] sm:$0xff]  ;;  %v583_v43 = vld [vmem:[%s354_s20] sm:$0x3]  ;;  %s958_s29 = sshll.u32 %s1181_s21, 6  ;;  %s1197_s20 = smov [#allocation3]  }
  0x4c   : > { %424 = vmatprep.subr.mxu0 %v387_v52  ;;  %968 = vmatprep.subr.mxu1 %v387_v52  ;;  %v582_v33 = vld [vmem:[%s1443_s5 + $0x78] sm:$0xff]  ;;  %v581_v34 = vld [vmem:[%s1443_s5 + $0x70] sm:$0xff]  ;;  %s1577_s21 = sadd.s32 %s958_s29, %s1492_s6  ;;  %s1089_s14 = sshll.u32 %s1197_s20, 4  ;;  %s1090_s14 = int_to_ptr.vmem [resolvable:$false] %s1089_s14 }
  0x4d   : > { %425 = vmatpush1.msra.mxu0 %v386_v53  ;;  %984 = vmatpush1.msra.mxu1 %v386_v53  ;;  %s954_s30 = sshll.u32 %s1577_s21, 7  ;;  %s1091_s29 = scalar_lea.vmem %s1090_s14, 8192 }
  0x4e   : > { %426 = vmatprep.subr.mxu0 %v385_v54  ;;  %969 = vmatprep.subr.mxu1 %v385_v54  ;;  %s1599_s8 = scalar_lea.hbm %s1672_s4, %s954_s30  ;;  %p1092_p8 = scmp.lt.s32.totalorder %s1603_s26, %s1090_s14 }
  0x4f   : > { %427 = vmatpush1.msra.mxu0 %v384_v55  ;;  %985 = vmatpush1.msra.mxu1 %v384_v55  ;;  %p1093_p9 = scmp.lt.s32.totalorder %s1091_s29, %s1085_s18 }
  0x50   : > { %428 = vmatprep.subr.mxu0 %v383_v56  ;;  %970 = vmatprep.subr.mxu1 %v383_v56 }
  0x51   : > { %429 = vmatpush1.msra.mxu0 %v382_v57  ;;  %986 = vmatpush1.msra.mxu1 %v382_v57  ;;  %p1094_p11 = por %p1093_p9, %p1092_p8 }
  0x52   : > { %430 = vmatprep.subr.mxu0 %v381_v58  ;;  %971 = vmatprep.subr.mxu1 %v381_v58 }
  0x53   : > { %431 = vmatpush1.msra.mxu0 %v380_v59  ;;  %987 = vmatpush1.msra.mxu1 %v380_v59  ;;  %p1095_p13 = pnand %p1094_p11, %p1088_p7 }
  0x54   : > { %432 = vmatprep.subr.mxu0 %v379_v60  ;;  %972 = vmatprep.subr.mxu1 %v379_v60 }
  0x55   : > { %433 = vmatpush1.msra.mxu0 %v378_v61  ;;  %988 = vmatpush1.msra.mxu1 %v378_v61 }
  0x56   : > { %434 = vmatprep.subr.mxu0 %v377_v62  ;;  %973 = vmatprep.subr.mxu1 %v377_v62 }
  0x57   : > { %435 = vmatpush1.msra.mxu0 %v376_v63  ;;  %989 = vmatpush1.msra.mxu1 %v376_v63 }
  0x58   : > { %436 = vmatprep.subr.mxu0 %v375_v0  ;;  %974 = vmatprep.subr.mxu1 %v375_v0 }
  0x59   : > { %437 = vmatpush1.msra.mxu0 %v374_v1  ;;  %990 = vmatpush1.msra.mxu1 %v374_v1 }
  0x5a   : > { %471 = vmatmul.mubr.f32.vlgmr.msra.gmra.mxu0 %v358_v2  ;;  %519 = vmatmul.mubr.f32.vlgmr.msra.gmra.mxu1 %v366_v3 }
  0x5b   : > { %476 = vmatprep.mubr.f32.mxu0 %v1195_v32  ;;  %524 = vmatprep.mubr.f32.mxu1 %v1195_v32 }
  0x5c   : > { %596 = vperm.xlu1 %1084, %v569_v4   ;;  %586 = vperm.xlu0 %1083, %v567_v5  }
  0x5e   : > { %477 = vmatmul.mubr.f32.gmra.mxu0 %v359_v6  ;;  %525 = vmatmul.mubr.f32.gmra.mxu1 %v367_v7 }
  0x5f   : > { %482 = vmatprep.mubr.f32.mxu0 %v1195_v32  ;;  %530 = vmatprep.mubr.f32.mxu1 %v1195_v32 }
  0x60   : > { %601 = vperm.xlu1 %1084, %v570_v8   ;;  %591 = vperm.xlu0 %1083, %v568_v9  }
  0x62   : > { %483 = vmatmul.mubr.f32.gmra.mxu0 %v360_v10  ;;  %531 = vmatmul.mubr.f32.gmra.mxu1 %v368_v11 }
  0x63   : > { %488 = vmatprep.mubr.f32.mxu0 %v1195_v32  ;;  %536 = vmatprep.mubr.f32.mxu1 %v1195_v32 }
  0x64   : > { %611 = vperm.xlu1 %1084, %v572_v12   ;;  %606 = vperm.xlu0 %1083, %v571_v13  }
  0x66   : > { %489 = vmatmul.mubr.f32.gmra.mxu0 %v361_v14  ;;  %537 = vmatmul.mubr.f32.gmra.mxu1 %v369_v15 }
  0x67   : > { %494 = vmatprep.mubr.f32.mxu0 %v1195_v32  ;;  %542 = vmatprep.mubr.f32.mxu1 %v1195_v32 }
  0x68   : > { %621 = vperm.xlu1 %1084, %v574_v16   ;;  %616 = vperm.xlu0 %1083, %v573_v17  }
  0x6a   : > { %495 = vmatmul.mubr.f32.gmra.mxu0 %v362_v18  ;;  %543 = vmatmul.mubr.f32.gmra.mxu1 %v370_v19 }
  0x6b   : > { %500 = vmatprep.mubr.f32.mxu0 %v1195_v32  ;;  %548 = vmatprep.mubr.f32.mxu1 %v1195_v32 }
  0x6c   : > { %631 = vperm.xlu1 %1084, %v576_v20   ;;  %626 = vperm.xlu0 %1083, %v575_v21  }
  0x6e   : > { %501 = vmatmul.mubr.f32.gmra.mxu0 %v363_v22  ;;  %549 = vmatmul.mubr.f32.gmra.mxu1 %v371_v23 }
  0x6f   : > { %506 = vmatprep.mubr.f32.mxu0 %v1195_v32  ;;  %554 = vmatprep.mubr.f32.mxu1 %v1195_v32 }
  0x70   : > { %641 = vperm.xlu1 %1084, %v578_v24   ;;  %636 = vperm.xlu0 %1083, %v577_v25  }
  0x72   : > { %507 = vmatmul.mubr.f32.gmra.mxu0 %v364_v26  ;;  %555 = vmatmul.mubr.f32.gmra.mxu1 %v372_v27 }
  0x73   : > { %512 = vmatprep.mubr.f32.mxu0 %v1195_v32  ;;  %560 = vmatprep.mubr.f32.mxu1 %v1195_v32  ;;  %v665_v32 = vlaneseq }
  0x74   : > { %651 = vperm.xlu1 %1084, %v580_v28   ;;  %646 = vperm.xlu0 %1083, %v579_v29  }
  0x75   : > { %v666_v40 = vshrl.u32 %v665_v32, 7 }
  0x76   : > { %513 = vmatmul.mubr.f32.gmra.mxu0 %v365_v30  ;;  %561 = vmatmul.mubr.f32.gmra.mxu1 %v373_v31 }
  0x77   : > { %v667_v41 = vsub.s32 0, %v666_v40  ;;  %v671_v45 = vsub.s32 1, %v666_v40 }
  0x78   : > { %661 = vperm.xlu1 %1084, %v582_v33   ;;  %656 = vperm.xlu0 %1083, %v581_v34  }
  0x79   : > { %v1509_v46 = vrot.slane %v583_v43, %v667_v41  ;;  %v1512_v47 = vrot.slane %v583_v43, %v671_v45 }
  0xd7   : > { %v587_v35 = vpop.permute.xlu0 %586  ;;  %v1494_v36 = vpop.permute.xlu1 %596 }
  0xd8   : > { %v675_v50 = vadd.f32 %v1509_v46, %v587_v35  ;;  %v676_v54 = vadd.f32 %v1512_v47, %v587_v35  ;;  %v679_v18 = vadd.f32 %v1509_v46, %v1494_v36  ;;  %v680_v26 = vadd.f32 %v1512_v47, %v1494_v36 }
  0xdb   : > { %v592_v37 = vpop.permute.xlu0 %591  ;;  %v1498_v38 = vpop.permute.xlu1 %601 }
  0xdc   : > { %v677_v1 = vadd.f32 %v1509_v46, %v592_v37  ;;  %v678_v9 = vadd.f32 %v1512_v47, %v592_v37  ;;  %v681_v37 = vadd.f32 %v1509_v46, %v1498_v38 }
  0xdf   : > { %v1500_v39 = vpop.permute.xlu0 %606  ;;  %v1505_v42 = vpop.permute.xlu1 %611 }
  0xe3   : > { %v1507_v44 = vpop.permute.xlu0 %616  ;;  %v1514_v48 = vpop.permute.xlu1 %621 }
  0xe7   : > { %v627_v49 = vpop.permute.xlu0 %626  ;;  %v632_v60 = vpop.permute.xlu1 %631 }
  0xe8   : > { %v691_v51 = vadd.f32 %v1509_v46, %v627_v49  ;;  %v692_v55 = vadd.f32 %v1512_v47, %v627_v49  ;;  %v693_v2 = vadd.f32 %v1509_v46, %v632_v60  ;;  %v694_v10 = vadd.f32 %v1512_v47, %v632_v60 }
  0xeb   : > { %v637_v13 = vpop.permute.xlu0 %636  ;;  %v642_v30 = vpop.permute.xlu1 %641 }
  0xec   : > { %v695_v19 = vadd.f32 %v1509_v46, %v637_v13  ;;  %v696_v27 = vadd.f32 %v1512_v47, %v637_v13  ;;  %v697_v32 = vadd.f32 %v1509_v46, %v642_v30 }
 0x11a   : > { %v472_v52 = vpop.f32.mrf.mxu0  ;;  %v520_v53 = vpop.f32.mrf.mxu1 }
 0x11b   : > { %v707_v56 = vmul.f32 2.0, %v472_v52  ;;  %v723_v57 = vmul.f32 2.0, %v520_v53 }
 0x11c   : > { %v474_v58 = vpop.f32.mrf.mxu0  ;;  %v522_v59 = vpop.f32.mrf.mxu1 }
 0x11d   : > { %v739_v61 = vsub.f32 %v675_v50, %v707_v56  ;;  %v755_v62 = vsub.f32 %v691_v51, %v723_v57  ;;  %v708_v63 = vmul.f32 2.0, %v474_v58  ;;  %v724_v0 = vmul.f32 2.0, %v522_v59 }
 0x11e   : > { %v478_v3 = vpop.f32.mrf.mxu0  ;;  %v526_v4 = vpop.f32.mrf.mxu1  ;;  %v682_v50 = vadd.f32 %v1512_v47, %v1498_v38  ;;  %v698_v51 = vadd.f32 %v1512_v47, %v642_v30  ;;  %v683_v59 = vadd.f32 %v1509_v46, %v1500_v39 }
 0x11f   : > { %771 = vst [vmem:[%s1524_s25] sm:$0xff] %v739_v61  ;;  %787 = vst [vmem:[%s1524_s25 + $0x80] sm:$0xff] %v755_v62  ;;  %v740_v5 = vsub.f32 %v676_v54, %v708_v63  ;;  %v756_v6 = vsub.f32 %v692_v55, %v724_v0  ;;  %v709_v7 = vmul.f32 2.0, %v478_v3  ;;  %v725_v8 = vmul.f32 2.0, %v526_v4  ;;  %v647_v54 = vpop.permute.xlu0 %646 }
 0x120   : > { %v480_v11 = vpop.f32.mrf.mxu0  ;;  %v528_v12 = vpop.f32.mrf.mxu1  ;;  %v699_v60 = vadd.f32 %v1509_v46, %v647_v54  ;;  %v700_v3 = vadd.f32 %v1512_v47, %v647_v54 }
 0x121   : > { %772 = vst [vmem:[%s1524_s25 + $0x8] sm:$0xff] %v740_v5  ;;  %788 = vst [vmem:[%s1524_s25 + $0x88] sm:$0xff] %v756_v6  ;;  %v741_v14 = vsub.f32 %v677_v1, %v709_v7  ;;  %v757_v15 = vsub.f32 %v693_v2, %v725_v8  ;;  %v710_v16 = vmul.f32 2.0, %v480_v11  ;;  %v726_v17 = vmul.f32 2.0, %v528_v12  ;;  %v652_v6 = vpop.permute.xlu1 %651 }
 0x122   : > { %v484_v20 = vpop.f32.mrf.mxu0  ;;  %v532_v21 = vpop.f32.mrf.mxu1  ;;  %v684_v2 = vadd.f32 %v1512_v47, %v1500_v39  ;;  %v685_v11 = vadd.f32 %v1509_v46, %v1505_v42  ;;  %v701_v39 = vadd.f32 %v1509_v46, %v652_v6 }
 0x123   : > { %773 = vst [vmem:[%s1524_s25 + $0x10] sm:$0xff] %v741_v14  ;;  %789 = vst [vmem:[%s1524_s25 + $0x90] sm:$0xff] %v757_v15  ;;  %v742_v22 = vsub.f32 %v678_v9, %v710_v16  ;;  %v758_v23 = vsub.f32 %v694_v10, %v726_v17  ;;  %v711_v24 = vmul.f32 2.0, %v484_v20  ;;  %v727_v25 = vmul.f32 2.0, %v532_v21  ;;  %v657_v14 = vpop.permute.xlu0 %656 }
 0x124   : > { %v486_v28 = vpop.f32.mrf.mxu0  ;;  %v534_v29 = vpop.f32.mrf.mxu1  ;;  %v702_v20 = vadd.f32 %v1512_v47, %v652_v6 }
 0x125   : > { %774 = vst [vmem:[%s1524_s25 + $0x18] sm:$0xff] %v742_v22  ;;  %790 = vst [vmem:[%s1524_s25 + $0x98] sm:$0xff] %v758_v23  ;;  %v743_v31 = vsub.f32 %v679_v18, %v711_v24  ;;  %v759_v33 = vsub.f32 %v695_v19, %v727_v25  ;;  %v712_v34 = vmul.f32 2.0, %v486_v28  ;;  %v728_v35 = vmul.f32 2.0, %v534_v29  ;;  %v662_v30 = vpop.permute.xlu1 %661 }
 0x126   : > { %v490_v36 = vpop.f32.mrf.mxu0  ;;  %v538_v40 = vpop.f32.mrf.mxu1  ;;  %v686_v19 = vadd.f32 %v1512_v47, %v1505_v42  ;;  %v703_v28 = vadd.f32 %v1509_v46, %v657_v14 }
 0x127   : > { %775 = vst [vmem:[%s1524_s25 + $0x20] sm:$0xff] %v743_v31  ;;  %791 = vst [vmem:[%s1524_s25 + $0xa0] sm:$0xff] %v759_v33  ;;  %v744_v41 = vsub.f32 %v680_v26, %v712_v34  ;;  %v760_v43 = vsub.f32 %v696_v27, %v728_v35  ;;  %v713_v45 = vmul.f32 2.0, %v490_v36  ;;  %v729_v49 = vmul.f32 2.0, %v538_v40 }
 0x128   : > { %v492_v52 = vpop.f32.mrf.mxu0  ;;  %v540_v53 = vpop.f32.mrf.mxu1  ;;  %v687_v27 = vadd.f32 %v1509_v46, %v1507_v44 }
 0x129   : > { %776 = vst [vmem:[%s1524_s25 + $0x28] sm:$0xff] %v744_v41  ;;  %792 = vst [vmem:[%s1524_s25 + $0xa8] sm:$0xff] %v760_v43  ;;  %v745_v55 = vsub.f32 %v681_v37, %v713_v45  ;;  %v761_v56 = vsub.f32 %v697_v32, %v729_v49  ;;  %v714_v57 = vmul.f32 2.0, %v492_v52  ;;  %v730_v58 = vmul.f32 2.0, %v540_v53 }
 0x12a   : > { %v496_v38 = vpop.f32.mrf.mxu0  ;;  %v544_v61 = vpop.f32.mrf.mxu1  ;;  %v688_v37 = vadd.f32 %v1512_v47, %v1507_v44  ;;  %v704_v32 = vadd.f32 %v1512_v47, %v657_v14 }
 0x12b   : > { %777 = vst [vmem:[%s1524_s25 + $0x30] sm:$0xff] %v745_v55  ;;  %793 = vst [vmem:[%s1524_s25 + $0xb0] sm:$0xff] %v761_v56  ;;  %v746_v62 = vsub.f32 %v682_v50, %v714_v57  ;;  %v762_v63 = vsub.f32 %v698_v51, %v730_v58  ;;  %v715_v0 = vmul.f32 2.0, %v496_v38  ;;  %v731_v1 = vmul.f32 2.0, %v544_v61 }
 0x12c   : > { %v498_v4 = vpop.f32.mrf.mxu0  ;;  %v546_v5 = vpop.f32.mrf.mxu1  ;;  %v689_v50 = vadd.f32 %v1509_v46, %v1514_v48  ;;  %v705_v51 = vadd.f32 %v1509_v46, %v662_v30  ;;  %v690_v57 = vadd.f32 %v1512_v47, %v1514_v48  ;;  %v706_v58 = vadd.f32 %v1512_v47, %v662_v30 }
 0x12d   : > { %778 = vst [vmem:[%s1524_s25 + $0x38] sm:$0xff] %v746_v62  ;;  %794 = vst [vmem:[%s1524_s25 + $0xb8] sm:$0xff] %v762_v63  ;;  %v747_v7 = vsub.f32 %v683_v59, %v715_v0  ;;  %v763_v8 = vsub.f32 %v699_v60, %v731_v1  ;;  %v716_v9 = vmul.f32 2.0, %v498_v4  ;;  %v732_v10 = vmul.f32 2.0, %v546_v5 }
 0x12e   : > { %v502_v12 = vpop.f32.mrf.mxu0  ;;  %v550_v13 = vpop.f32.mrf.mxu1 }
 0x12f   : > { %779 = vst [vmem:[%s1524_s25 + $0x40] sm:$0xff] %v747_v7  ;;  %795 = vst [vmem:[%s1524_s25 + $0xc0] sm:$0xff] %v763_v8  ;;  %v748_v15 = vsub.f32 %v684_v2, %v716_v9  ;;  %v764_v16 = vsub.f32 %v700_v3, %v732_v10  ;;  %v717_v17 = vmul.f32 2.0, %v502_v12  ;;  %v733_v18 = vmul.f32 2.0, %v550_v13 }
 0x130   : > { %v504_v21 = vpop.f32.mrf.mxu0  ;;  %v552_v22 = vpop.f32.mrf.mxu1 }
 0x131   : > { %780 = vst [vmem:[%s1524_s25 + $0x48] sm:$0xff] %v748_v15  ;;  %796 = vst [vmem:[%s1524_s25 + $0xc8] sm:$0xff] %v764_v16  ;;  %v749_v23 = vsub.f32 %v685_v11, %v717_v17  ;;  %v765_v24 = vsub.f32 %v701_v39, %v733_v18  ;;  %v718_v25 = vmul.f32 2.0, %v504_v21  ;;  %v734_v26 = vmul.f32 2.0, %v552_v22 }
 0x132   : > { %v508_v42 = vpop.f32.mrf.mxu0  ;;  %v556_v29 = vpop.f32.mrf.mxu1 }
 0x133   : > { %781 = vst [vmem:[%s1524_s25 + $0x50] sm:$0xff] %v749_v23  ;;  %797 = vst [vmem:[%s1524_s25 + $0xd0] sm:$0xff] %v765_v24  ;;  %v750_v31 = vsub.f32 %v686_v19, %v718_v25  ;;  %v766_v33 = vsub.f32 %v702_v20, %v734_v26  ;;  %v719_v34 = vmul.f32 2.0, %v508_v42  ;;  %v735_v35 = vmul.f32 2.0, %v556_v29 }
 0x134   : > { %v510_v36 = vpop.f32.mrf.mxu0  ;;  %v558_v40 = vpop.f32.mrf.mxu1 }
 0x135   : > { %782 = vst [vmem:[%s1524_s25 + $0x58] sm:$0xff] %v750_v31  ;;  %798 = vst [vmem:[%s1524_s25 + $0xd8] sm:$0xff] %v766_v33  ;;  %v751_v41 = vsub.f32 %v687_v27, %v719_v34  ;;  %v767_v43 = vsub.f32 %v703_v28, %v735_v35  ;;  %v720_v45 = vmul.f32 2.0, %v510_v36  ;;  %v736_v49 = vmul.f32 2.0, %v558_v40 }
 0x136   : > { %v514_v44 = vpop.f32.mrf.mxu0  ;;  %v562_v52 = vpop.f32.mrf.mxu1 }
 0x137   : > { %783 = vst [vmem:[%s1524_s25 + $0x60] sm:$0xff] %v751_v41  ;;  %799 = vst [vmem:[%s1524_s25 + $0xe0] sm:$0xff] %v767_v43  ;;  %v752_v53 = vsub.f32 %v688_v37, %v720_v45  ;;  %v768_v54 = vsub.f32 %v704_v32, %v736_v49  ;;  %v721_v55 = vmul.f32 2.0, %v514_v44  ;;  %v737_v56 = vmul.f32 2.0, %v562_v52 }
 0x138   : > { %v516_v46 = vpop.f32.mrf.mxu0  ;;  %v564_v59 = vpop.f32.mrf.mxu1 }
 0x139   : > { %784 = vst [vmem:[%s1524_s25 + $0x68] sm:$0xff] %v752_v53  ;;  %800 = vst [vmem:[%s1524_s25 + $0xe8] sm:$0xff] %v768_v54  ;;  %v753_v60 = vsub.f32 %v689_v50, %v721_v55  ;;  %v769_v38 = vsub.f32 %v705_v51, %v737_v56  ;;  %v722_v61 = vmul.f32 2.0, %v516_v46  ;;  %v738_v62 = vmul.f32 2.0, %v564_v59 }
 0x13b   : > { %785 = vst [vmem:[%s1524_s25 + $0x70] sm:$0xff] %v753_v60  ;;  %801 = vst [vmem:[%s1524_s25 + $0xf0] sm:$0xff] %v769_v38  ;;  %v754_v47 = vsub.f32 %v690_v57, %v722_v61  ;;  %v770_v48 = vsub.f32 %v706_v58, %v738_v62 }
 0x13d   : > { %786 = vst [vmem:[%s1524_s25 + $0x78] sm:$0xff] %v754_v47  ;;  %802 = vst [vmem:[%s1524_s25 + $0xf8] sm:$0xff] %v770_v48 }
 0x13e   : > { %1098 = shalt.err (!%p1095_p13)
}
 0x13f   : > { %s1099_s13 = scalar_lea.hbm %s1599_s8, 4096  ;;  %s1103_s30 = scalar_lea.hbm %s1672_s4, 16384 }
 0x140   : > { %p1100_p0 = scmp.ne.s32.totalorder %s1599_s8, %s1099_s13  ;;  %p1104_p3 = scmp.lt.s32.totalorder %s1599_s8, %s1672_s4 }
 0x141   : > { %p1105_p4 = scmp.lt.s32.totalorder %s1103_s30, %s1099_s13 }
 0x142   : > { %p1101_p1 = pnand %p1100_p0, %p1305_p10 }
 0x143   : > { %p1106_p5 = por %p1105_p4, %p1104_p3 }
 0x144   : > { %p1102_p2 = pneg %p1101_p1 }
 0x146   : > { %p1107_p6 = pnand %p1106_p5, %p1102_p2 }
 0x148   : > { %1110 = shalt.err (!%p1107_p6)
}
 0x149   : > { %s1198_s18 = smov 256   ;;  %s1199_s20 = smov 512  }
 0x14a   : > { %s1200_s14 = smov 16  }
 0x14b   : > { %991 = dma.vmem_to_hbm [thread:$0]  (%p1305_p10), %s1603_s26, 4096, %s1599_s8, %s1611_s9, %s1198_s18, %s1199_s20, %s1200_s14  }
 0x14c PF: > { %p997_p7 = scmp.ge.s32.totalorder %s1193_s24, 2  ;;  %s835_s29 = sand.u32 1, %s1157_s15  }
 0x14d   : > { %s836_s13 = scalar_lea.sflag [#allocation4], %s835_s29 }
 0x14e   : > { %p994_p8 = pnand %p997_p7, %p1312_p12 }
 0x150   : > { %p995_p9 = pneg %p994_p8 }
 0x152   : > { %1152 = dma.done.wait (%p995_p9), %s836_s13, 4096  }
 0x153   : > { %1154 = vsyncadd (%p995_p9), %s836_s13, 4294963200  ;;  %s17_s24 = sadd.s32 1, %s1193_s24   ;;  %s1676_s15 = smov %s1161_s16 }
 0x154   : > { %p14_p11 = scmp.ge.s32.totalorder %s17_s24, 6   ;;  %s1677_s16 = smov %s1165_s17 }
 0x155   : > { %s1678_s17 = smov %s1310_s11  ;;  %s1679_s18 = smov %s1173_s19 }
 0x156   : > { %s1680_s19 = smov %s1299_s7  ;;  %s1681_s20 = smov %s1185_s22 }
 0x157   : > { %s1682_s21 = smov %s1189_s23  ;;  %s1683_s22 = smov %s1686_s27 }
 0x158   : > { %s1684_s23 = smov %s1690_s28  ;;  %16 = sbr.rel (!%p14_p11) target bundleno = 6 (0x6), region = 108 }
 0x15d   :  { %841 = vsyncpa [#allocation4], 1 }
 0x15e   :  { %843 = vsyncpa [#allocation4 + $0x1], 1 }

</bundles_post_ra>
